<compile_context>
chip_gen: v7x
topology: tpu7x:2x2x1
jax: 0.10.0
libtpu: 0.0.40
codegen_flags: <defaults>
</compile_context>

<pallas_src>
import functools

import jax
import jax.numpy as jnp
from jax.experimental import pallas as pl
from jax.experimental.pallas import tpu as pltpu


# --------------------------- small helpers ---------------------------

def _round_up(x, m):
    return ((x + m - 1) // m) * m


def _pad2(a, r, c):
    return jnp.pad(a, ((0, r - a.shape[0]), (0, c - a.shape[1])))


def _pick_row_tile(n):
    for t in (256, 128):
        if n % t == 0:
            return t
    return n  # small graphs: single tile (block == full array dims is legal)


_VMEM_LIMIT = 32 * 1024 * 1024  # explicit; raise on v6e for large N, never > 64MiB on v7x


# --------------------------- GIN encoder kernel ---------------------------

def _gin_kernel(x_ref, a_ref, p_ref, w_ref, b_ref, o_ref, hb0, hb1, pooled,
                *, readout, tm):
    """grid = (layer, row_tile). Streams (tm, N) row tiles of A; node activations
    ping-pong between two (N, Dp) VMEM buffers across layers; pooled (G, Dp)
    accumulates P @ h per row tile; output written on the final tile."""
    l = pl.program_id(0)
    r = pl.program_id(1)
    n_layers = pl.num_programs(0)
    nr = pl.num_programs(1)
    row0 = pl.multiple_of(r * tm, tm)
    lp = l % 2  # layer l reads hb0 if even else hb1, writes the other one

    # stage the (padded) node features into the ping buffer once
    @pl.when((l == 0) & (r == 0))
    def _():
        hb0[...] = x_ref[...]
        hb1[...] = jnp.zeros_like(hb1)

    h_full = jnp.where(lp == 0, hb0[...], hb1[...])                       # (N, Dp)
    h_rows = jnp.where(lp == 0, hb0[pl.ds(row0, tm), :], hb1[pl.ds(row0, tm), :])

    # GIN aggregation: (1+eps)*x_i + sum_j A[i,j] x_j  with eps = 0
    # TODO(synk): WGINConv train_eps / nonzero eps not modeled (eps fixed at 0).
    agg = h_rows + jnp.dot(a_ref[...], h_full.astype(jnp.bfloat16),
                           preferred_element_type=jnp.float32)            # (tm, Dp)

    wb = w_ref[...]            # (1, 2, Dp, Dp) packed [w1, w2] of this layer
    bb = b_ref[...]            # (1, 2, 1, Dp)  packed [b1, b2]
    h1 = jnp.maximum(
        jnp.dot(agg, wb[0, 0], preferred_element_type=jnp.float32) + bb[0, 0], 0.0)
    hout = jnp.maximum(
        jnp.dot(h1, wb[0, 1], preferred_element_type=jnp.float32) + bb[0, 1], 0.0)

    # write new activations into the pong buffer for the next layer
    @pl.when(lp == 0)
    def _():
        hb1[pl.ds(row0, tm), :] = hout

    @pl.when(lp == 1)
    def _():
        hb0[pl.ds(row0, tm), :] = hout

    # partial global_add_pool for this row tile
    if readout == "add":
        @pl.when((l == 0) & (r == 0))
        def _():
            pooled[...] = jnp.zeros_like(pooled)
    else:
        @pl.when(r == 0)
        def _():
            pooled[...] = jnp.zeros_like(pooled)

    pooled[...] += jnp.dot(p_ref[...], hout.astype(jnp.bfloat16),
                           preferred_element_type=jnp.float32)

    if readout == "concat":
        @pl.when(r == nr - 1)
        def _():
            o_ref[...] = pooled[...]
    else:  # 'last' or 'add'
        @pl.when((l == n_layers - 1) & (r == nr - 1))
        def _():
            o_ref[...] = pooled[...]


def gin_encode(x_pad, A_bf, P_bf, Wg, Bg, *, readout, tm, Dp):
    N = x_pad.shape[0]
    G = P_bf.shape[0]
    L = Wg.shape[0]
    R = N // tm
    if readout == "concat":
        out_cols = L * Dp
        out_spec = pl.BlockSpec((G, Dp), lambda l, r: (0, l))
    else:
        out_cols = Dp
        out_spec = pl.BlockSpec((G, Dp), lambda l, r: (0, 0))
    return pl.pallas_call(
        functools.partial(_gin_kernel, readout=readout, tm=tm),
        out_shape=jax.ShapeDtypeStruct((G, out_cols), jnp.float32),
        grid=(L, R),
        in_specs=[
            pl.BlockSpec((N, Dp), lambda l, r: (0, 0)),            # x (resident)
            pl.BlockSpec((tm, N), lambda l, r: (r, 0)),            # A row tile (bf16)
            pl.BlockSpec((G, tm), lambda l, r: (0, r)),            # P col tile (bf16)
            pl.BlockSpec((1, 2, Dp, Dp), lambda l, r: (l, 0, 0, 0)),  # packed weights
            pl.BlockSpec((1, 2, 1, Dp), lambda l, r: (l, 0, 0, 0)),   # packed biases
        ],
        out_specs=out_spec,
        scratch_shapes=[pltpu.VMEM((N, Dp), jnp.float32),
                        pltpu.VMEM((N, Dp), jnp.float32),
                        pltpu.VMEM((G, Dp), jnp.float32)],
        # row axis must be "arbitrary": pooled scratch accumulates across tiles and
        # the next layer needs the full activation buffer.
        compiler_params=pltpu.CompilerParams(
            dimension_semantics=("arbitrary", "arbitrary"),
            vmem_limit_bytes=_VMEM_LIMIT),
    )(x_pad, A_bf, P_bf, Wg, Bg)


# --------------------------- RW_NN encoder kernel ---------------------------

def _rwnn_kernel(x_ref, a_ref, p_ref, invn_ref, adjbd_ref, fcw_ref, fcb_ref,
                 z0_ref, m_ref, fc1b_ref, o_ref,
                 xh_even, xh_odd, zxbuf, zbuf, acc, *, normalize, tm):
    """grid = (step, row_tile). N-major random-walk kernel: xh (node features)
    ping-pongs across steps, z (hidden-graph features) updated once per step,
    fc1 is folded into the step loop via the pre-built M matrices."""
    i = pl.program_id(0)
    r = pl.program_id(1)
    n_step = pl.num_programs(0)
    nr = pl.num_programs(1)
    row0 = pl.multiple_of(r * tm, tm)
    ip = i % 2   # step i's xh lives in xh_even if even else xh_odd

    @pl.when((i == 0) & (r == 0))
    def _():
        zbuf[...] = z0_ref[...]
        acc[...] = jnp.zeros_like(acc)
        xh_odd[...] = jnp.zeros_like(xh_odd)

    # hidden-graph walk state update once per step: z <- adj_hidden_norm @ z
    @pl.when((i > 0) & (r == 0))
    def _():
        zbuf[...] = jnp.dot(adjbd_ref[...], zbuf[...].astype(jnp.bfloat16),
                            preferred_element_type=jnp.float32)

    # node state: step 0 -> sigmoid(fc(x)); step i>0 -> A @ xh_{i-1} (add-aggregate)
    @pl.when(i == 0)
    def _():
        xr = x_ref[pl.ds(row0, tm), :]
        v = jax.nn.sigmoid(
            jnp.dot(xr, fcw_ref[...], preferred_element_type=jnp.float32)
            + fcb_ref[...])
        xh_even[pl.ds(row0, tm), :] = v

    xh_prev = jnp.where(ip == 0, xh_odd[...], xh_even[...])    # full prev-step xh

    @pl.when((i > 0) & (ip == 0))
    def _():
        xh_even[pl.ds(row0, tm), :] = jnp.dot(
            a_ref[...], xh_prev.astype(jnp.bfloat16),
            preferred_element_type=jnp.float32)

    @pl.when((i > 0) & (ip == 1))
    def _():
        xh_odd[pl.ds(row0, tm), :] = jnp.dot(
            a_ref[...], xh_prev.astype(jnp.bfloat16),
            preferred_element_type=jnp.float32)

    xh_now = jnp.where(ip == 0, xh_even[pl.ds(row0, tm), :],
                       xh_odd[pl.ds(row0, tm), :])              # (tm, Dp)

    # t = xh_now @ z^T  -> (tm, H*S): big N dimension on the MXU M edge
    t = jax.lax.dot_general(xh_now, zbuf[...], (((1,), (1,)), ((), ())),
                            preferred_element_type=jnp.float32)

    @pl.when(i == 0)
    def _():
        zxbuf[pl.ds(row0, tm), :] = t   # zx = step-0 t, reused every step

    prod = zxbuf[pl.ds(row0, tm), :] * t                         # f32 elementwise
    # dropout on t is an inference no-op here

    # fold S-sum + per-step fc1 slice: M_i[h*S+s, :] = fc1_w[i*H+h, :]
    contrib = jnp.dot(prod, m_ref[0], preferred_element_type=jnp.float32)  # (tm, Dp)

    pooled = jnp.dot(p_ref[...], contrib.astype(jnp.bfloat16),
                     preferred_element_type=jnp.float32)                   # (G, Dp)
    if normalize:
        pooled = pooled * invn_ref[...]          # (G,1) broadcast (1 / counts)
    acc[...] += pooled

    @pl.when((i == n_step - 1) & (r == nr - 1))
    def _():
        o_ref[...] = jnp.maximum(acc[...] + fc1b_ref[...], 0.0)


def rwnn_encode(x_pad, A_bf, P_bf, inv_norm, adjbd_bf, fcw, fcb, z0, M, fc1b,
                *, max_step, normalize, tm, Dp):
    N = x_pad.shape[0]
    G = P_bf.shape[0]
    HS = z0.shape[0]
    R = N // tm
    return pl.pallas_call(
        functools.partial(_rwnn_kernel, normalize=normalize, tm=tm),
        out_shape=jax.ShapeDtypeStruct((G, Dp), jnp.float32),
        grid=(max_step, R),
        in_specs=[
            pl.BlockSpec((N, Dp), lambda i, r: (0, 0)),          # x (resident)
            pl.BlockSpec((tm, N), lambda i, r: (r, 0)),          # A row tile (bf16)
            pl.BlockSpec((G, tm), lambda i, r: (0, r)),          # P col tile (bf16)
            pl.BlockSpec((G, 1), lambda i, r: (0, 0)),           # 1/counts
            pl.BlockSpec((HS, HS), lambda i, r: (0, 0)),         # block-diag adj (bf16)
            pl.BlockSpec((Dp, Dp), lambda i, r: (0, 0)),         # fc weight (padded)
            pl.BlockSpec((1, Dp), lambda i, r: (0, 0)),          # fc bias
            pl.BlockSpec((HS, Dp), lambda i, r: (0, 0)),         # z0 (features_hidden)
            pl.BlockSpec((1, HS, Dp), lambda i, r: (i, 0, 0)),   # per-step folded fc1
            pl.BlockSpec((1, Dp), lambda i, r: (0, 0)),          # fc1 bias
        ],
        out_specs=pl.BlockSpec((G, Dp), lambda i, r: (0, 0)),
        scratch_shapes=[pltpu.VMEM((N, Dp), jnp.float32),        # xh (even steps)
                        pltpu.VMEM((N, Dp), jnp.float32),        # xh (odd steps)
                        pltpu.VMEM((N, HS), jnp.float32),        # zx (step-0 t)
                        pltpu.VMEM((HS, Dp), jnp.float32),       # evolving z
                        pltpu.VMEM((G, Dp), jnp.float32)],       # fc1 accumulator
        compiler_params=pltpu.CompilerParams(
            dimension_semantics=("arbitrary", "arbitrary"),
            vmem_limit_bytes=_VMEM_LIMIT),
    )(x_pad, A_bf, P_bf, inv_norm, adjbd_bf, fcw, fcb, z0, M, fc1b)


# --------------------------- projection heads kernel ---------------------------

def _proj_kernel(y_ref, w1_ref, b1_ref, w2_ref, b2_ref, o_ref):
    h = jnp.maximum(
        jnp.dot(y_ref[...], w1_ref[...], preferred_element_type=jnp.float32)
        + b1_ref[...], 0.0)
    o_ref[...] = jnp.dot(h, w2_ref[...],
                         preferred_element_type=jnp.float32) + b2_ref[...]


def proj_heads(y_list, heads, Ep):
    """All 4 heads as one block-diagonal (G,4Ep)@(4Ep,4Ep) Linear-ReLU-Linear."""
    G = y_list[0].shape[0]
    K = len(heads)
    Y = jnp.concatenate(y_list, axis=1)                           # (G, K*Ep)

    def bd(ws):
        out = jnp.zeros((K * Ep, K * Ep), jnp.float32)
        for k, w in enumerate(ws):
            out = out.at[k * Ep:k * Ep + w.shape[0],
                         k * Ep:k * Ep + w.shape[1]].set(w)
        return out

    def cb(bs):
        return jnp.concatenate(
            [jnp.pad(b, (0, Ep - b.shape[0])) for b in bs]).reshape(1, K * Ep)

    W1 = bd([h[0] for h in heads])
    B1 = cb([h[1] for h in heads])
    W2 = bd([h[2] for h in heads])
    B2 = cb([h[3] for h in heads])

    out = pl.pallas_call(
        _proj_kernel,
        out_shape=jax.ShapeDtypeStruct((G, K * Ep), jnp.float32),
        grid=(1,),
        in_specs=[pl.BlockSpec((G, K * Ep), lambda i: (0, 0)),
                  pl.BlockSpec((K * Ep, K * Ep), lambda i: (0, 0)),
                  pl.BlockSpec((1, K * Ep), lambda i: (0, 0)),
                  pl.BlockSpec((K * Ep, K * Ep), lambda i: (0, 0)),
                  pl.BlockSpec((1, K * Ep), lambda i: (0, 0))],
        out_specs=pl.BlockSpec((G, K * Ep), lambda i: (0, 0)),
        compiler_params=pltpu.CompilerParams(
            dimension_semantics=("arbitrary",),
            vmem_limit_bytes=_VMEM_LIMIT),
    )(Y, W1, B1, W2, B2)
    return [out[:, k * Ep:(k + 1) * Ep] for k in range(K)]


# --------------------------- parameter init ---------------------------

def xavier_uniform(key, fan_in, fan_out):
    limit = (6.0 / (fan_in + fan_out)) ** 0.5
    return jax.random.uniform(key, (fan_in, fan_out), jnp.float32, -limit, limit)


def init_params(key, input_dim, hidden_dim, encoder_layers,
                hidden_graphs, size_hidden_graphs, max_step, embedding_dim):
    keys = iter(jax.random.split(key, 64))
    p = {}
    gin = []
    for i in range(encoder_layers):
        fin = input_dim if i == 0 else hidden_dim
        w1 = xavier_uniform(next(keys), fin, hidden_dim)
        w2 = xavier_uniform(next(keys), hidden_dim, hidden_dim)
        gin.append((w1, jnp.zeros((hidden_dim,), jnp.float32),
                    w2, jnp.zeros((hidden_dim,), jnp.float32)))
    p["gin"] = gin
    p["adj_hidden"] = jax.random.uniform(
        next(keys),
        (hidden_graphs, size_hidden_graphs * (size_hidden_graphs - 1) // 2),
        jnp.float32, -1.0, 1.0)
    p["features_hidden"] = jax.random.uniform(
        next(keys), (hidden_graphs, size_hidden_graphs, hidden_dim),
        jnp.float32, 0.0, 1.0)
    p["fc_w"] = xavier_uniform(next(keys), input_dim, hidden_dim)
    p["fc_b"] = jnp.zeros((hidden_dim,), jnp.float32)
    p["fc1_w"] = xavier_uniform(next(keys), hidden_graphs * max_step, hidden_dim)
    p["fc1_b"] = jnp.zeros((hidden_dim,), jnp.float32)
    for name in ["proj_implicit", "proj_explicit", "proj_implicit1", "proj_explicit1"]:
        w1 = xavier_uniform(next(keys), embedding_dim, embedding_dim)
        w2 = xavier_uniform(next(keys), embedding_dim, embedding_dim)
        p[name] = (w1, jnp.zeros((embedding_dim,), jnp.float32),
                   w2, jnp.zeros((embedding_dim,), jnp.float32))
    return p


# --------------------------- forward pass ---------------------------

def kbgad_forward(params, x, A, P, counts, cfg):
    # args.type_learner not in {'mlp','gnn','att'} -> view_learner is None:
    # batch_aug_edge_weight = None, reg = None; second encoder pass is identical.
    # TODO(synk): ViewLearner / Gumbel edge sampling branch not instantiated.
    hidden = cfg["hidden_dim"]
    H = cfg["hidden_graphs"]
    S = cfg["size_hidden_graphs"]
    L = cfg["encoder_layers"]
    ms = cfg["max_step"]
    N, F = x.shape
    G = P.shape[0]
    Dp = _round_up(max(F, hidden), 128)          # lane-dense working width
    tm = _pick_row_tile(N)

    # ---- one-time host-side prep (padding, packing, bf16 casts) ----
    x_pad = jnp.pad(x, ((0, 0), (0, Dp - F)))
    A_bf = A.astype(jnp.bfloat16)                # {0,1} -> exact in bf16
    P_bf = P.astype(jnp.bfloat16)                # {0,1} -> exact in bf16
    inv_norm = (1.0 / jnp.maximum(counts, 1.0)).reshape(G, 1)

    Wg, Bg = [], []
    for (w1, b1, w2, b2) in params["gin"]:
        Wg.append(jnp.stack([_pad2(w1, Dp, Dp), _pad2(w2, Dp, Dp)]))
        Bg.append(jnp.stack([_pad2(b1.reshape(1, -1), 1, Dp),
                             _pad2(b2.reshape(1, -1), 1, Dp)]))
    Wg = jnp.stack(Wg)                           # (L, 2, Dp, Dp)
    Bg = jnp.stack(Bg)                           # (L, 2, 1, Dp)

    # RW_NN hidden-graph adjacency, block-diagonal over the H hidden graphs
    iu0, iu1 = jnp.triu_indices(S, k=1)
    adj_vals = jax.nn.relu(params["adj_hidden"])
    adj = jnp.zeros((H, S, S), jnp.float32).at[:, iu0, iu1].set(adj_vals)
    adj = adj + jnp.transpose(adj, (0, 2, 1))
    adj_bd = jnp.zeros((H * S, H * S), jnp.float32)
    for h in range(H):
        adj_bd = adj_bd.at[h * S:(h + 1) * S, h * S:(h + 1) * S].set(adj[h])
    adjbd_bf = adj_bd.astype(jnp.bfloat16)

    fcw = _pad2(params["fc_w"], Dp, Dp)
    fcb = _pad2(params["fc_b"].reshape(1, -1), 1, Dp)
    z0 = _pad2(params["features_hidden"].reshape(H * S, hidden), H * S, Dp)
    # fold the S-sum and per-step fc1 slice: M[i, h*S+s, :] = fc1_w[i*H+h, :]
    M = jnp.repeat(params["fc1_w"].reshape(ms, H, hidden), S, axis=1)
    M = jnp.pad(M, ((0, 0), (0, 0), (0, Dp - hidden)))
    fc1b = _pad2(params["fc1_b"].reshape(1, -1), 1, Dp)

    # ---- encoders (row-tile pipelined over A) ----
    y_imp_p = gin_encode(x_pad, A_bf, P_bf, Wg, Bg,
                         readout=cfg["readout"], tm=tm, Dp=Dp)
    y_exp_p = rwnn_encode(x_pad, A_bf, P_bf, inv_norm, adjbd_bf, fcw, fcb, z0, M,
                          fc1b, max_step=ms, normalize=cfg["normalize"],
                          tm=tm, Dp=Dp)
    # second pass (edge_weight=None, dropout off) is bit-identical -> reuse.

    emb = hidden * L if cfg["readout"] == "concat" else hidden
    Ep = _round_up(emb, 128)
    if cfg["readout"] == "concat":
        y_imp_c = jnp.concatenate(
            [y_imp_p[:, l * Dp:l * Dp + hidden] for l in range(L)], axis=1)
        y_imp_in = jnp.pad(y_imp_c, ((0, 0), (0, Ep - emb)))
        y_exp_in = jnp.pad(y_exp_p[:, :hidden], ((0, 0), (0, Ep - hidden)))
    else:
        y_imp_in = y_imp_p[:, :Ep]
        y_exp_in = y_exp_p[:, :Ep]

    heads = [params["proj_implicit"], params["proj_explicit"],
             params["proj_implicit1"], params["proj_explicit1"]]
    o1, o2, o3, o4 = proj_heads([y_imp_in, y_exp_in, y_imp_in, y_exp_in], heads, Ep)

    reg = None
    batch_aug_edge_weight = None
    return (o1[:, :emb], o2[:, :emb], o3[:, :emb], o4[:, :emb],
            reg, batch_aug_edge_weight)


# --------------------------------- main --------------------------------

if __name__ == "__main__":
    key = jax.random.PRNGKey(0)
    cfg = dict(input_dim=8, hidden_dim=32, encoder_layers=2, dropout=0.0,
               pooling="add", readout="last", hidden_graphs=4,
               size_hidden_graphs=5, max_step=3, normalize=True)
    # TODO(synk): pooling='max' (global_max_pool) not implemented; 'add' used here.
    N, G = 16, 2
    embedding_dim = cfg["hidden_dim"]  # readout != 'concat'

    k_x, k_e, k_p = jax.random.split(key, 3)
    x = jax.random.normal(k_x, (N, cfg["input_dim"]), jnp.float32)

    # random directed edges -> dense adjacency A[dst, src] = 1
    n_edges = 40
    src = jax.random.randint(k_e, (n_edges,), 0, N)
    dst = jax.random.randint(jax.random.fold_in(k_e, 1), (n_edges,), 0, N)
    A = jnp.zeros((N, N), jnp.float32).at[dst, src].set(1.0)

    # batch assignment: first 8 nodes -> graph 0, last 8 -> graph 1
    batch = jnp.concatenate([jnp.zeros((8,), jnp.int32), jnp.ones((8,), jnp.int32)])
    P = (batch[None, :] == jnp.arange(G)[:, None]).astype(jnp.float32)   # (G, N)
    counts = P.sum(axis=1)                                               # (G,)

    params = init_params(k_p, cfg["input_dim"], cfg["hidden_dim"],
                         cfg["encoder_layers"], cfg["hidden_graphs"],
                         cfg["size_hidden_graphs"], cfg["max_step"], embedding_dim)

    outs = kbgad_forward(params, x, A, P, counts, cfg)
    for o in outs:
        if o is not None:
            jax.block_until_ready(o)
    assert outs[0].shape == (G, embedding_dim)
    assert outs[1].shape == (G, embedding_dim)
    assert outs[2].shape == (G, embedding_dim)
    assert outs[3].shape == (G, embedding_dim)
    print("KERNEL_OK")
</pallas_src>

<mosaic_0001>
module attributes {stable_mosaic.version = 11 : i64} {
  func.func @_gin_kernel(%arg0: i32, %arg1: i32, %arg2: memref<16x128xf32, #tpu.memory_space<vmem>>, %arg3: memref<16x16xbf16, #tpu.memory_space<vmem>>, %arg4: memref<2x16xbf16, #tpu.memory_space<vmem>>, %arg5: memref<1x2x128x128xf32, #tpu.memory_space<vmem>>, %arg6: memref<1x2x1x128xf32, #tpu.memory_space<vmem>>, %arg7: memref<2x128xf32, #tpu.memory_space<vmem>>, %arg8: memref<16x128xf32, #tpu.memory_space<vmem>>, %arg9: memref<16x128xf32, #tpu.memory_space<vmem>>, %arg10: memref<2x128xf32, #tpu.memory_space<vmem>>) attributes {dimension_semantics = [#tpu.dimension_semantics<arbitrary>, #tpu.dimension_semantics<arbitrary>], iteration_bounds = array<i64: 2, 1>, scalar_prefetch = 0 : i64, scratch_operands = 3 : i64, tpu.core_type = #tpu.core_type<tc>, window_params = [{pipeline_mode = #tpu.pipeline_mode<synchronous>, transform_indices = @transform_0, window_bounds = array<i64: 16, 128>}, {transform_indices = @transform_1, window_bounds = array<i64: 16, 16>}, {transform_indices = @transform_2, window_bounds = array<i64: 2, 16>}, {transform_indices = @transform_3, window_bounds = array<i64: 1, 2, 128, 128>}, {transform_indices = @transform_4, window_bounds = array<i64: 1, 2, 1, 128>}, {pipeline_mode = #tpu.pipeline_mode<synchronous>, transform_indices = @transform_5, window_bounds = array<i64: 2, 128>}]} {
    %c16_i32 = arith.constant 16 : i32
    %0 = arith.muli %arg1, %c16_i32 : i32
    %1 = tpu.assume_multiple %0, 16 : i32
    %c2_i32 = arith.constant 2 : i32
    %c0_i32 = arith.constant 0 : i32
    %2 = arith.cmpi eq, %c2_i32, %c0_i32 : i32
    %c1_i32 = arith.constant 1 : i32
    %3 = arith.select %2, %c1_i32, %c2_i32 : i32
    %4 = arith.remsi %arg0, %3 : i32
    %c0_i32_0 = arith.constant 0 : i32
    %5 = arith.cmpi ne, %4, %c0_i32_0 : i32
    %c0_i32_1 = arith.constant 0 : i32
    %6 = arith.cmpi slt, %4, %c0_i32_1 : i32
    %c0_i32_2 = arith.constant 0 : i32
    %7 = arith.cmpi slt, %3, %c0_i32_2 : i32
    %8 = arith.xori %6, %7 : i1
    %9 = arith.andi %8, %5 : i1
    %10 = arith.addi %4, %3 : i32
    %11 = arith.select %9, %10, %4 : i32
    %c0_i32_3 = arith.constant 0 : i32
    %12 = arith.cmpi eq, %arg0, %c0_i32_3 : i32
    %c0_i32_4 = arith.constant 0 : i32
    %13 = arith.cmpi eq, %arg1, %c0_i32_4 : i32
    %14 = arith.andi %12, %13 : i1
    %15 = arith.extui %14 : i1 to i32
    %c0_i32_5 = arith.constant 0 : i32
    %16 = arith.cmpi ne, %15, %c0_i32_5 : i32
    scf.if %16 {
      %c0_43 = arith.constant 0 : index
      %c0_44 = arith.constant 0 : index
      %71 = vector.load %arg2[%c0_43, %c0_44] : memref<16x128xf32, #tpu.memory_space<vmem>>, vector<16x128xf32>
      %c0_45 = arith.constant 0 : index
      %c0_46 = arith.constant 0 : index
      %72 = vector.load %arg8[%c0_45, %c0_46] : memref<16x128xf32, #tpu.memory_space<vmem>>, vector<16x128xf32>
      tpu.vector_store %arg8[%c0_45, %c0_46], %71 {strides = array<i32>} : memref<16x128xf32, #tpu.memory_space<vmem>>, vector<16x128xf32>,
      %cst_47 = arith.constant 0.000000e+00 : f32
      %73 = vector.broadcast %cst_47 : f32 to vector<16x128xf32>
      %c0_48 = arith.constant 0 : index
      %c0_49 = arith.constant 0 : index
      %74 = vector.load %arg9[%c0_48, %c0_49] : memref<16x128xf32, #tpu.memory_space<vmem>>, vector<16x128xf32>
      tpu.vector_store %arg9[%c0_48, %c0_49], %73 {strides = array<i32>} : memref<16x128xf32, #tpu.memory_space<vmem>>, vector<16x128xf32>,
    } else {
    }
    %c0_i32_6 = arith.constant 0 : i32
    %17 = arith.cmpi eq, %11, %c0_i32_6 : i32
    %c0 = arith.constant 0 : index
    %c0_7 = arith.constant 0 : index
    %18 = vector.load %arg8[%c0, %c0_7] : memref<16x128xf32, #tpu.memory_space<vmem>>, vector<16x128xf32>
    %c0_8 = arith.constant 0 : index
    %c0_9 = arith.constant 0 : index
    %19 = vector.load %arg9[%c0_8, %c0_9] : memref<16x128xf32, #tpu.memory_space<vmem>>, vector<16x128xf32>
    %20 = arith.select %17, %18, %19 : vector<16x128xf32>
    %c0_i32_10 = arith.constant 0 : i32
    %21 = arith.cmpi eq, %11, %c0_i32_10 : i32
    %22 = arith.index_cast %1 : i32 to index
    %c0_11 = arith.constant 0 : index
    %23 = vector.load %arg8[%22, %c0_11] : memref<16x128xf32, #tpu.memory_space<vmem>>, vector<16x128xf32>
    %24 = arith.index_cast %1 : i32 to index
    %c0_12 = arith.constant 0 : index
    %25 = vector.load %arg9[%24, %c0_12] : memref<16x128xf32, #tpu.memory_space<vmem>>, vector<16x128xf32>
    %26 = arith.select %21, %23, %25 : vector<16x128xf32>
    %c0_13 = arith.constant 0 : index
    %c0_14 = arith.constant 0 : index
    %27 = vector.load %arg3[%c0_13, %c0_14] : memref<16x16xbf16, #tpu.memory_space<vmem>>, vector<16x16xbf16>
    %28 = arith.truncf %20 : vector<16x128xf32> to vector<16x128xbf16>
    %cst = arith.constant dense<0.000000e+00> : vector<16x128xf32>
    %29 = tpu.matmul %27, %28, %cst {dimension_numbers = #tpu.dot_dimension_numbers<[1], [0], [0], [1], [0, 0, 1, 1], [], []>} : vector<16x16xbf16>, vector<16x128xbf16>, vector<16x128xf32> -> vector<16x128xf32>
    %30 = arith.addf %26, %29 : vector<16x128xf32>
    %c0_15 = arith.constant 0 : index
    %c0_16 = arith.constant 0 : index
    %c0_17 = arith.constant 0 : index
    %c0_18 = arith.constant 0 : index
    %31 = vector.load %arg5[%c0_15, %c0_16, %c0_17, %c0_18] : memref<1x2x128x128xf32, #tpu.memory_space<vmem>>, vector<1x2x128x128xf32>
    %c0_19 = arith.constant 0 : index
    %c0_20 = arith.constant 0 : index
    %c0_21 = arith.constant 0 : index
    %c0_22 = arith.constant 0 : index
    %32 = vector.load %arg6[%c0_19, %c0_20, %c0_21, %c0_22] : memref<1x2x1x128xf32, #tpu.memory_space<vmem>>, vector<1x2x1x128xf32>
    %33 = vector.extract_strided_slice %31 {offsets = [0, 0, 0, 0], sizes = [1, 1, 128, 128], strides = [1, 1, 1, 1]} : vector<1x2x128x128xf32> to vector<1x1x128x128xf32>
    %34 = vector.shape_cast %33 : vector<1x1x128x128xf32> to vector<128x128xf32>
    %cst_23 = arith.constant dense<0.000000e+00> : vector<16x128xf32>
    %35 = tpu.matmul %30, %34, %cst_23 {dimension_numbers = #tpu.dot_dimension_numbers<[1], [0], [0], [1], [0, 0, 1, 1], [], []>} : vector<16x128xf32>, vector<128x128xf32>, vector<16x128xf32> -> vector<16x128xf32>
    %36 = vector.extract_strided_slice %32 {offsets = [0, 0, 0, 0], sizes = [1, 1, 1, 128], strides = [1, 1, 1, 1]} : vector<1x2x1x128xf32> to vector<1x1x1x128xf32>
    %37 = vector.shape_cast %36 : vector<1x1x1x128xf32> to vector<1x128xf32>
    %38 = vector.broadcast %37 : vector<1x128xf32> to vector<16x128xf32>
    %39 = arith.addf %35, %38 : vector<16x128xf32>
    %cst_24 = arith.constant 0.000000e+00 : f32
    %40 = vector.broadcast %cst_24 : f32 to vector<16x128xf32>
    %41 = arith.maximumf %39, %40 : vector<16x128xf32>
    %42 = vector.extract_strided_slice %31 {offsets = [0, 1, 0, 0], sizes = [1, 1, 128, 128], strides = [1, 1, 1, 1]} : vector<1x2x128x128xf32> to vector<1x1x128x128xf32>
    %43 = vector.shape_cast %42 : vector<1x1x128x128xf32> to vector<128x128xf32>
    %cst_25 = arith.constant dense<0.000000e+00> : vector<16x128xf32>
    %44 = tpu.matmul %41, %43, %cst_25 {dimension_numbers = #tpu.dot_dimension_numbers<[1], [0], [0], [1], [0, 0, 1, 1], [], []>} : vector<16x128xf32>, vector<128x128xf32>, vector<16x128xf32> -> vector<16x128xf32>
    %45 = vector.extract_strided_slice %32 {offsets = [0, 1, 0, 0], sizes = [1, 1, 1, 128], strides = [1, 1, 1, 1]} : vector<1x2x1x128xf32> to vector<1x1x1x128xf32>
    %46 = vector.shape_cast %45 : vector<1x1x1x128xf32> to vector<1x128xf32>
    %47 = vector.broadcast %46 : vector<1x128xf32> to vector<16x128xf32>
    %48 = arith.addf %44, %47 : vector<16x128xf32>
    %cst_26 = arith.constant 0.000000e+00 : f32
    %49 = vector.broadcast %cst_26 : f32 to vector<16x128xf32>
    %50 = arith.maximumf %48, %49 : vector<16x128xf32>
    %c0_i32_27 = arith.constant 0 : i32
    %51 = arith.cmpi eq, %11, %c0_i32_27 : i32
    %52 = arith.extui %51 : i1 to i32
    %c0_i32_28 = arith.constant 0 : i32
    %53 = arith.cmpi ne, %52, %c0_i32_28 : i32
    scf.if %53 {
      %71 = arith.index_cast %1 : i32 to index
      %c0_43 = arith.constant 0 : index
      %72 = vector.load %arg9[%71, %c0_43] : memref<16x128xf32, #tpu.memory_space<vmem>>, vector<16x128xf32>
      tpu.vector_store %arg9[%71, %c0_43], %50 {strides = array<i32>} : memref<16x128xf32, #tpu.memory_space<vmem>>, vector<16x128xf32>,
    } else {
    }
    %c1_i32_29 = arith.constant 1 : i32
    %54 = arith.cmpi eq, %11, %c1_i32_29 : i32
    %55 = arith.extui %54 : i1 to i32
    %c0_i32_30 = arith.constant 0 : i32
    %56 = arith.cmpi ne, %55, %c0_i32_30 : i32
    scf.if %56 {
      %71 = arith.index_cast %1 : i32 to index
      %c0_43 = arith.constant 0 : index
      %72 = vector.load %arg8[%71, %c0_43] : memref<16x128xf32, #tpu.memory_space<vmem>>, vector<16x128xf32>
      tpu.vector_store %arg8[%71, %c0_43], %50 {strides = array<i32>} : memref<16x128xf32, #tpu.memory_space<vmem>>, vector<16x128xf32>,
    } else {
    }
    %c0_i32_31 = arith.constant 0 : i32
    %57 = arith.cmpi eq, %arg1, %c0_i32_31 : i32
    %58 = arith.extui %57 : i1 to i32
    %c0_i32_32 = arith.constant 0 : i32
    %59 = arith.cmpi ne, %58, %c0_i32_32 : i32
    scf.if %59 {
      %cst_43 = arith.constant 0.000000e+00 : f32
      %71 = vector.broadcast %cst_43 : f32 to vector<2x128xf32>
      %c0_44 = arith.constant 0 : index
      %c0_45 = arith.constant 0 : index
      %72 = vector.load %arg10[%c0_44, %c0_45] : memref<2x128xf32, #tpu.memory_space<vmem>>, vector<2x128xf32>
      tpu.vector_store %arg10[%c0_44, %c0_45], %71 {strides = array<i32>} : memref<2x128xf32, #tpu.memory_space<vmem>>, vector<2x128xf32>,
    } else {
    }
    %c0_33 = arith.constant 0 : index
    %c0_34 = arith.constant 0 : index
    %60 = vector.load %arg10[%c0_33, %c0_34] : memref<2x128xf32, #tpu.memory_space<vmem>>, vector<2x128xf32>
    %c0_35 = arith.constant 0 : index
    %c0_36 = arith.constant 0 : index
    %61 = vector.load %arg4[%c0_35, %c0_36] : memref<2x16xbf16, #tpu.memory_space<vmem>>, vector<2x16xbf16>
    %62 = arith.truncf %50 : vector<16x128xf32> to vector<16x128xbf16>
    %cst_37 = arith.constant dense<0.000000e+00> : vector<2x128xf32>
    %63 = tpu.matmul %61, %62, %cst_37 {dimension_numbers = #tpu.dot_dimension_numbers<[1], [0], [0], [1], [0, 0, 1, 1], [], []>} : vector<2x16xbf16>, vector<16x128xbf16>, vector<2x128xf32> -> vector<2x128xf32>
    %64 = arith.addf %60, %63 : vector<2x128xf32>
    %c0_38 = arith.constant 0 : index
    %c0_39 = arith.constant 0 : index
    %65 = vector.load %arg10[%c0_38, %c0_39] : memref<2x128xf32, #tpu.memory_space<vmem>>, vector<2x128xf32>
    tpu.vector_store %arg10[%c0_38, %c0_39], %64 {strides = array<i32>} : memref<2x128xf32, #tpu.memory_space<vmem>>, vector<2x128xf32>,
    %c1_i32_40 = arith.constant 1 : i32
    %66 = arith.cmpi eq, %arg0, %c1_i32_40 : i32
    %c0_i32_41 = arith.constant 0 : i32
    %67 = arith.cmpi eq, %arg1, %c0_i32_41 : i32
    %68 = arith.andi %66, %67 : i1
    %69 = arith.extui %68 : i1 to i32
    %c0_i32_42 = arith.constant 0 : i32
    %70 = arith.cmpi ne, %69, %c0_i32_42 : i32
    scf.if %70 {
      %c0_43 = arith.constant 0 : index
      %c0_44 = arith.constant 0 : index
      %71 = vector.load %arg10[%c0_43, %c0_44] : memref<2x128xf32, #tpu.memory_space<vmem>>, vector<2x128xf32>
      %c0_45 = arith.constant 0 : index
      %c0_46 = arith.constant 0 : index
      %72 = vector.load %arg7[%c0_45, %c0_46] : memref<2x128xf32, #tpu.memory_space<vmem>>, vector<2x128xf32>
      tpu.vector_store %arg7[%c0_45, %c0_46], %71 {strides = array<i32>} : memref<2x128xf32, #tpu.memory_space<vmem>>, vector<2x128xf32>,
    } else {
    }
    return
  }
  func.func @transform_0(%arg0: i32, %arg1: i32) -> (i32, i32) {
    %c0_i32 = arith.constant 0 : i32
    %c0_i32_0 = arith.constant 0 : i32
    %c0_i32_1 = arith.constant 0 : i32
    return %c0_i32, %c0_i32_0 : i32, i32
  }
  func.func @transform_1(%arg0: i32, %arg1: i32) -> (i32, i32) {
    %c0_i32 = arith.constant 0 : i32
    %c0_i32_0 = arith.constant 0 : i32
    return %arg1, %c0_i32 : i32, i32
  }
  func.func @transform_2(%arg0: i32, %arg1: i32) -> (i32, i32) {
    %c0_i32 = arith.constant 0 : i32
    %c0_i32_0 = arith.constant 0 : i32
    return %c0_i32, %arg1 : i32, i32
  }
  func.func @transform_3(%arg0: i32, %arg1: i32) -> (i32, i32, i32, i32) {
    %c0_i32 = arith.constant 0 : i32
    %c0_i32_0 = arith.constant 0 : i32
    %c0_i32_1 = arith.constant 0 : i32
    %c0_i32_2 = arith.constant 0 : i32
    return %arg0, %c0_i32, %c0_i32_0, %c0_i32_1 : i32, i32, i32, i32
  }
  func.func @transform_4(%arg0: i32, %arg1: i32) -> (i32, i32, i32, i32) {
    %c0_i32 = arith.constant 0 : i32
    %c0_i32_0 = arith.constant 0 : i32
    %c0_i32_1 = arith.constant 0 : i32
    %c0_i32_2 = arith.constant 0 : i32
    return %arg0, %c0_i32, %c0_i32_0, %c0_i32_1 : i32, i32, i32, i32
  }
  func.func @transform_5(%arg0: i32, %arg1: i32) -> (i32, i32) {
    %c0_i32 = arith.constant 0 : i32
    %c0_i32_0 = arith.constant 0 : i32
    %c0_i32_1 = arith.constant 0 : i32
    return %c0_i32, %c0_i32_0 : i32, i32
  }
}

</mosaic_0001>

<bundles_post_ra>
// kernel: tpu_custom_call.1
= control target key start
LH: loop header
LB: loop body
LE: loop exit
PB: predicated region body
PF: predicated region fallthrough
CT: control target
= control target key end

     0   :  { %10 = vsyncpa [#allocation6], 0  ;;  %s1615_s0 = inlined_call_operand.hbm [shape: f32[16,128], index: 0, kind: input, shape index: {}]   ;;  %s1616_s1 = inlined_call_operand.hbm [shape: bf16[16,16], index: 1, kind: input, shape index: {}]   ;;  %s1617_s2 = inlined_call_operand.vmem [shape: bf16[2,16], index: 2, kind: input, shape index: {}]   ;;  %s1618_s3 = inlined_call_operand.hbm [shape: f32[2,2,128,128], index: 3, kind: input, shape index: {}]   ;;  %s1619_s4 = inlined_call_operand.vmem [shape: f32[2,2,1,128], index: 4, kind: input, shape index: {}]   ;;  %s1620_s5 = inlined_call_operand.hbm [shape: f32[2,128], index: 5, kind: output, shape index: {}]  }
   0x1   :  { %11 = vsyncpa [#allocation9], 0 }
   0x2   :  { %12 = vsyncpa [#allocation7], 0  ;;  %s1321_s18 = smov 0   ;;  %s1323_s19 = smov 0  }
   0x3   :  { %s1325_s20 = smov 0   ;;  %s1327_s21 = smov 0  }
   0x4   :  { %s1329_s22 = smov 0   ;;  %s1331_s23 = smov 0  }
   0x5 LB: > { %s1350_s24 = sadd.s32 4294967295, %s1278_s23   ;;  %p117_p0 = scmp.ne.s32.totalorder %s1266_s20, %s1262_s19  ;;  %s1278_s23 = sphi %s1331_s23, %s18_s23   ;;  %s1274_s22 = sphi %s1329_s22, %s1641_s22   ;;  %s1270_s21 = sphi %s1327_s21, %s1640_s21   ;;  %s1266_s20 = sphi %s1325_s20, %s1639_s20   ;;  %s1262_s19 = sphi %s1323_s19, %s1638_s19   ;;  %s1258_s18 = sphi %s1321_s18, %s1637_s18  }
   0x6   : > { %p118_p1 = scmp.eq.s32.totalorder %s1278_s23, 0  ;;  %p123_p2 = scmp.ne.s32.totalorder %s1262_s19, %s1258_s18 }
   0x7   : > { %p1621_p3 = scmp.eq.s32.totalorder %s1350_s24, 0  ;;  %p795_p4 = scmp.ge.s32.totalorder %s1278_s23, 1 }
   0x8   : > { %p119_p5 = por %p118_p1, %p117_p0  ;;  %p181_p6 = scmp.lt.s32.totalorder %s1278_s23, 3 }
   0x9   : > { %p1361_p7 = por %p1621_p3, %p123_p2  ;;  %s1280_s27 = smov [#allocation5]  }
   0xa   : > { %p1365_p8 = pnand %p795_p4, %p181_p6  ;;  %s193_s28 = sshll.u32 %s1280_s27, 4  ;;  %s194_s28 = int_to_ptr.vmem [resolvable:$true] %s193_s28 }
   0xb   : > { %s1625_s25 = scalar_select %p1361_p7, 1, 0 }
   0xc   : > { %s1626_s26 = scalar_select %p1365_p8, 1, 0 }
   0xd   : > { %p1027_p9 = pneg %p1365_p8  ;;  %p1040_p11 = scmp.lt.s32.totalorder %s1278_s23, 2 }
   0xe   : > { %s1104_s8 = scalar_lea.hbm %s1615_s0, 256 }
   0xf   : > { %p1373_p10 = pnand %p1027_p9, %p1621_p3  ;;  %p1378_p12 = pnand %p1040_p11, %p119_p5 }
  0x10   : > { %p1105_p13 = scmp.ne.s32.totalorder %s1615_s0, %s1104_s8  ;;  %p1111_p4 = scmp.lt.u32.totalorder %s1104_s8, %s1615_s0 }
  0x11   : > { %s1628_s30 = scalar_select %p1378_p12, 1, 0 }
  0x12   : > { %p1106_p0 = pneg %p1373_p10 }
  0x14   : > { %p1107_p1 = pnand %p1106_p0, %p1105_p13 }
  0x16   : > { %p1108_p2 = pneg %p1107_p1 }
  0x18   : > { %p1113_p5 = pnand %p1111_p4, %p1108_p2 }
  0x1a   : > { %1116 = shalt.err (!%p1113_p5)
}
  0x1b   : > { %s1117_s13 = scalar_lea.vmem %s194_s28, 256  ;;  %p1125_p3 = scmp.lt.s32.totalorder %s194_s28, %s194_s28 }
  0x1c   : > { %p1118_p6 = scmp.ne.s32.totalorder %s194_s28, %s1117_s13  ;;  %p1126_p7 = scmp.lt.s32.totalorder %s1117_s13, %s1117_s13 }
  0x1e   : > { %p1120_p9 = pnand %p1118_p6, %p1106_p0  ;;  %p1127_p8 = por %p1126_p7, %p1125_p3 }
  0x20   : > { %p1121_p11 = pneg %p1120_p9 }
  0x22   : > { %p1128_p12 = pnand %p1127_p8, %p1121_p11 }
  0x24   : > { %1131 = shalt.err (!%p1128_p12)
}
  0x25   : > { %s1281_s14 = smov 128   ;;  %s1282_s15 = smov 8  }
  0x26   : > { %1030 = dma.hbm_to_vmem [thread:$0]  (!%p1373_p10), %s1615_s0, 256, %s194_s28, [#allocation6], %s1281_s14, %s1281_s14, %s1282_s15  }
  0x27   : > { %s1283_s18 = smov [#allocation8]   ;;  %s1132_s8 = scalar_lea.hbm %s1616_s1, 128 }
  0x28   : > { %s209_s27 = sshll.u32 %s1283_s18, 4  ;;  %p1133_p3 = scmp.ne.s32.totalorder %s1616_s1, %s1132_s8  ;;  %s210_s27 = int_to_ptr.vmem [resolvable:$true] %s209_s27 }
  0x29   : > { %p1139_p12 = scmp.lt.u32.totalorder %s1132_s8, %s1616_s1 }
  0x2a   : > { %p1135_p7 = pnand %p1133_p3, %p1106_p0 }
  0x2c   : > { %p1136_p8 = pneg %p1135_p7 }
  0x2e   : > { %p1141_p13 = pnand %p1139_p12, %p1136_p8 }
  0x30   : > { %1144 = shalt.err (!%p1141_p13)
}
  0x31   : > { %s1145_s28 = scalar_lea.vmem %s210_s27, 128  ;;  %p1153_p5 = scmp.lt.s32.totalorder %s210_s27, %s210_s27 }
  0x32   : > { %p1146_p1 = scmp.ne.s32.totalorder %s210_s27, %s1145_s28  ;;  %p1154_p6 = scmp.lt.s32.totalorder %s1145_s28, %s1145_s28 }
  0x34   : > { %p1148_p2 = pnand %p1146_p1, %p1106_p0  ;;  %p1155_p9 = por %p1154_p6, %p1153_p5 }
  0x36   : > { %p1149_p4 = pneg %p1148_p2 }
  0x38   : > { %p1156_p11 = pnand %p1155_p9, %p1149_p4 }
  0x3a   : > { %1159 = shalt.err (!%p1156_p11)
}
  0x3b   : > { %s1284_s13 = smov 64   ;;  %s1285_s16 = smov 4  }
  0x3c   : > { %1033 = dma.hbm_to_vmem [thread:$0]  (!%p1373_p10), %s1616_s1, 128, %s210_s27, [#allocation9], %s1284_s13, %s1284_s13, %s1285_s16  }
  0x3d   : > { %s110_s6 = sadd.s32 1, %s1266_s20  ;;  %s229_s7 = sand.u32 1, %s1278_s23  }
  0x3e   : > { %s30_s8 = sadd.s32 1, %s1274_s22  ;;  %s231_s9 = sand.u32 1, %s1266_s20  }
  0x3f   : > { %p32_p0 = scmp.ge.s32.totalorder %s30_s8, 2  ;;  %s800_s10 = sshll.u32 %s231_s9, 8 }
  0x40   : > { %s824_s11 = sshll.u32 %s1274_s22, 12  ;;  %s233_s13 = scalar_lea.vmem [#allocation10], %s800_s10 }
  0x41   : > { %s1643_s8 = smov (%p32_p0, %s30_s8), 0  ;;  %s1437_s29 = scalar_lea.hbm %s1618_s3, %s824_s11 }
  0x42   : > { %s107_s27 = ssub.s32 %s1274_s22, %s1643_s8  ;;  %s240_s16 = sshll.u32 %s233_s13, 4  ;;  %s1445_s16 = int_to_ptr.vmem [resolvable:$true] %s240_s16 }
  0x43   : > { %p1441_p10 = scmp.eq.s32.totalorder %s107_s27, 0  ;;  %s1447_s18 = scalar_lea.sflag [#allocation6], %s229_s7 }
  0x44   : > { %s1160_s9 = scalar_lea.hbm %s1437_s29, 4096  ;;  %p1630_p7 = scmp.ne.s32.totalorder %s1628_s30, 0 }
  0x45   : > { %p1161_p3 = scmp.ne.s32.totalorder %s1437_s29, %s1160_s9  ;;  %s1165_s10 = scalar_lea.hbm %s1618_s3, 8192 }
  0x46   : > { %p1162_p8 = pneg %p1630_p7  ;;  %p1166_p1 = scmp.lt.u32.totalorder %s1437_s29, %s1618_s3 }
  0x47   : > { %p1167_p2 = scmp.lt.u32.totalorder %s1165_s10, %s1160_s9  ;;  %p1169_p5 = scmp.lt.u32.totalorder %s1160_s9, %s1437_s29 }
  0x48   : > { %p1163_p12 = pnand %p1162_p8, %p1161_p3 }
  0x49   : > { %p1168_p4 = por %p1167_p2, %p1166_p1 }
  0x4a   : > { %p1164_p13 = pneg %p1163_p12 }
  0x4b   : > { %p1170_p6 = por %p1169_p5, %p1168_p4 }
  0x4d   : > { %p1171_p9 = pnand %p1170_p6, %p1164_p13 }
  0x4f   : > { %1174 = shalt.err (!%p1171_p9)
}
  0x50   : > { %s1175_s7 = scalar_lea.vmem %s1445_s16, 4096  ;;  %s1286_s13 = smov [#allocation10]  }
  0x51   : > { %p1176_p11 = scmp.ne.s32.totalorder %s1445_s16, %s1175_s7  ;;  %s1180_s11 = sshll.u32 %s1286_s13, 4  ;;  %s1181_s11 = int_to_ptr.vmem [resolvable:$false] %s1180_s11 }
  0x52   : > { %s1182_s12 = scalar_lea.vmem %s1181_s11, 8192  ;;  %p1183_p12 = scmp.lt.s32.totalorder %s1445_s16, %s1181_s11 }
  0x53   : > { %p1178_p0 = pnand %p1176_p11, %p1162_p8  ;;  %p1184_p1 = scmp.lt.s32.totalorder %s1182_s12, %s1175_s7 }
  0x55   : > { %p1179_p3 = pneg %p1178_p0  ;;  %p1185_p2 = por %p1184_p1, %p1183_p12 }
  0x57   : > { %p1186_p4 = pnand %p1185_p2, %p1179_p3 }
  0x59   : > { %1189 = shalt.err (!%p1186_p4)
}
  0x5a   : > { %1037 = dma.hbm_to_vmem [thread:$0]  (!%p1630_p7), %s1437_s29, 4096, %s1445_s16, %s1447_s18, %s1281_s14, %s1281_s14, %s1282_s15  }
  0x5b   : > { %s1483_s9 = scalar_select %p1441_p10, %s1266_s20, %s110_s6  }
  0x5c   : > { %p1631_p8 = scmp.ne.s32.totalorder %s1626_s26, 0 }
  0x5d   : > { %p1632_p13 = scmp.eq.s32.totalorder (!%p1631_p8), %s1350_s24, 0 }
  0x5e   : > { %259 = sbr.rel (%p1631_p8) target bundleno = 1047 (0x417), region = 40 }
  0x65   : > { %1241 = dma.done.wait (%p1632_p13), [#allocation6], 256   ;;  %p1633_p5 = pmov %p1632_p13 }
  0x67   : > { %1243 = vsyncadd (%p1633_p5), [#allocation6], 4294967040  ;;  %p1634_p6 = pmov %p1633_p5 }
  0x68   : > { %p1635_p9 = pmov %p1633_p5 }
  0x69   : > { %1245 = dma.done.wait (%p1634_p6), [#allocation9], 128  }
  0x6a   : > { %1247 = vsyncadd (%p1635_p9), [#allocation9], 4294967168  ;;  %s269_s30 = sand.u32 1, %s1350_s24   ;;  %s271_s14 = sand.u32 1, %s1262_s19  }
  0x6b   : > { %s806_s15 = sshll.u32 %s271_s14, 8  ;;  %s270_s26 = scalar_lea.sflag [#allocation6], %s269_s30 }
  0x6c   : > { %s1497_s6 = scalar_lea.vmem [#allocation10], %s806_s15  ;;  %p1636_p10 = scmp.ne.s32.totalorder %s1625_s25, 0 }
  0x6e   : > { %1249 = dma.done.wait (%p1636_p10), %s270_s26, 4096  }
  0x6f   : > { %1251 = vsyncadd (%p1636_p10), %s270_s26, 4294963200  ;;  %p306_p7 = scmp.lt.s32.totalorder %s1270_s21, 1  ;;  %p312_p11 = scmp.lt.s32.totalorder %s1270_s21, 0 }
  0x70   : > { %s313_s29 = ssub.s32 0, %s1270_s21  ;;  %p324_p0 = scmp.eq.s32.totalorder %s1270_s21, 0 }
  0x71   : > { %s307_s16 = scalar_select %p306_p7, %s1270_s21, 1 }
  0x72   : > { %s808_s17 = smin.u32 %s1270_s21, %s313_s29  ;;  %329 = sbr.rel (!%p324_p0) target bundleno = 121 (0x79), region = 56  ;;  %v330_v0 = vld [vmem:[#allocation5] sm:$0xff] (%p324_p0)  ;;  %v331_v1 = vld [vmem:[#allocation5 + $0x8] sm:$0xff] (%p324_p0)  ;;  %v1287_v2 = vmov (%p324_p0), 0.0  }
  0x73   : > { %s807_s18 = sshll.u32 %s307_s16, 1  ;;  %s315_s10 = sand.u32 1, %s808_s17   ;;  %332 = vst [vmem:[#allocation2] sm:$0xff] (%p324_p0), %v330_v0  ;;  %333 = vst [vmem:[#allocation2 + $0x8] sm:$0xff] (%p324_p0), %v331_v1 }
  0x74   : > { %s1512_s7 = scalar_lea.vmem %s1619_s4, %s807_s18  ;;  %s316_s25 = ssub.s32 0, %s315_s10  ;;  %334 = vst [vmem:[#allocation3] sm:$0xff] (%p324_p0), %v1287_v2  ;;  %335 = vst [vmem:[#allocation3 + $0x8] sm:$0xff] (%p324_p0), %v1287_v2 }
  0x75   : > { %s1645_s25 = smov (!%p312_p11, %s316_s25), %s315_s10 }
  0x76   : > { %p810_p3 = scmp.lt.s32.totalorder %s1645_s25, 0  ;;  %s322_s13 = sadd.s32 2, %s1645_s25 }
  0x78   : > { %s1647_s13 = smov (!%p810_p3, %s322_s13), %s1645_s25 }
  0x79 PF: > { %p336_p12 = scmp.eq.s32.totalorder %s1647_s13, 0  ;;  %v1288_v3 = vmov 0.0   ;;  %vm1289_vm0 = vmmov 0   ;;  %v409_v7 = vld [vmem:[%s1497_s6] sm:$0xff]  ;;  %v410_v8 = vld [vmem:[%s1497_s6 + $0x8] sm:$0xff]  ;;  %v411_v11 = vld [vmem:[%s1497_s6 + $0x10] sm:$0xff] }
  0x7a   : > { %867 = vmatprep.subr.bf16.mxu0 %v1288_v3  ;;  %v337_v4 = vld [vmem:[#allocation2] sm:$0xff]  ;;  %v338_v5 = vld [vmem:[#allocation2 + $0x8] sm:$0xff]  ;;  %869 = vmatprep.mubr.msk.bf16.mxu0 %vm1289_vm0, %v1288_v3  ;;  %v949_v10 = vpack.c.bf16 %v410_v8, %v409_v7  ;;  %v412_v12 = vld [vmem:[%s1497_s6 + $0x18] sm:$0xff]  ;;  %vm362_vm2 = vcmask 130048   ;;  %p816_p1 = scmp.ne.s32.totalorder %s1647_s13, 0 }
  0x7b   : > { %v339_v6 = vld [vmem:[#allocation3] sm:$0xff]  ;;  %s341_s11 = scalar_select %p336_p12, 1, 0  ;;  %v340_v9 = vld [vmem:[#allocation3 + $0x8] sm:$0xff]  ;;  %v953_v14 = vpack.c.bf16 %v412_v12, %v411_v11  ;;  %v414_v16 = vld [vmem:[%s1497_s6 + $0x28] sm:$0xff] }
  0x7c   : > { %v413_v15 = vld [vmem:[%s1497_s6 + $0x20] sm:$0xff]  ;;  %950 = vmatprep.subr.bf16.mxu1 %v949_v10  ;;  %v1103_v21 = vld [vmem:[#allocation8] sm:$0xff]   ;;  %v415_v22 = vld [vmem:[%s1497_s6 + $0x30] sm:$0xff] }
  0x7d   : > { %v342_v13 = vstv %s341_s11  ;;  %952 = vmatpush3.bf16.msra.mxu1 %v949_v10  ;;  %v957_v20 = vpack.c.bf16 %v414_v16, %v413_v15  ;;  %v416_v23 = vld [vmem:[%s1497_s6 + $0x38] sm:$0xff]  ;;  %v417_v25 = vld [vmem:[%s1497_s6 + $0x40] sm:$0xff]  ;;  %v418_v26 = vld [vmem:[%s1497_s6 + $0x48] sm:$0xff] }
  0x7e   : > { %vm343_vm1 = vcmp.eq.s32.totalorder %v342_v13, 1  ;;  %954 = vmatprep.subr.bf16.mxu1 %v953_v14  ;;  %v961_v24 = vpack.c.bf16 %v416_v23, %v415_v22  ;;  %v965_v27 = vpack.c.bf16 %v418_v26, %v417_v25  ;;  %v419_v28 = vld [vmem:[%s1497_s6 + $0x50] sm:$0xff]  ;;  %v420_v29 = vld [vmem:[%s1497_s6 + $0x58] sm:$0xff]  ;;  %v421_v31 = vld [vmem:[%s1497_s6 + $0x60] sm:$0xff] }
  0x7f   : > { %v1526_v17 = vsel %vm343_vm1, %v337_v4, %v339_v6  ;;  %v1528_v18 = vsel %vm343_vm1, %v338_v5, %v340_v9  ;;  %v969_v30 = vpack.c.bf16 %v420_v29, %v419_v28  ;;  %v422_v32 = vld [vmem:[%s1497_s6 + $0x68] sm:$0xff]  ;;  %v423_v34 = vld [vmem:[%s1497_s6 + $0x70] sm:$0xff]  ;;  %v424_v35 = vld [vmem:[%s1497_s6 + $0x78] sm:$0xff] }
  0x80   : > { %v356_v19 = vpack.c.bf16 %v1528_v18, %v1526_v17  ;;  %v973_v33 = vpack.c.bf16 %v422_v32, %v421_v31  ;;  %v977_v36 = vpack.c.bf16 %v424_v35, %v423_v34  ;;  %v425_v37 = vld [vmem:[%s1497_s6 + $0x80] sm:$0xff]  ;;  %v426_v38 = vld [vmem:[%s1497_s6 + $0x88] sm:$0xff]  ;;  %v427_v39 = vld [vmem:[%s1497_s6 + $0x90] sm:$0xff] }
  0x81   : > { %956 = vmatpush3.bf16.msra.mxu1 %v953_v14  ;;  %v981_v40 = vpack.c.bf16 %v426_v38, %v425_v37  ;;  %v428_v41 = vld [vmem:[%s1497_s6 + $0x98] sm:$0xff]  ;;  %v429_v43 = vld [vmem:[%s1497_s6 + $0xa0] sm:$0xff]  ;;  %v430_v44 = vld [vmem:[%s1497_s6 + $0xa8] sm:$0xff] }
  0x82   : > { %868 = vmatpush3.bf16.msra.mxu0 %v356_v19  ;;  %958 = vmatprep.subr.bf16.mxu1 %v957_v20  ;;  %v985_v42 = vpack.c.bf16 %v428_v41, %v427_v39  ;;  %v989_v45 = vpack.c.bf16 %v430_v44, %v429_v43  ;;  %v431_v46 = vld [vmem:[%s1497_s6 + $0xb0] sm:$0xff]  ;;  %v432_v47 = vld [vmem:[%s1497_s6 + $0xb8] sm:$0xff]  ;;  %v433_v49 = vld [vmem:[%s1497_s6 + $0xc0] sm:$0xff] }
  0x83   : > { %982 = vmatprep.subr.bf16.mxu0 %v981_v40  ;;  %v993_v48 = vpack.c.bf16 %v432_v47, %v431_v46  ;;  %v434_v50 = vld [vmem:[%s1497_s6 + $0xc8] sm:$0xff]  ;;  %v435_v52 = vld [vmem:[%s1497_s6 + $0xd0] sm:$0xff]  ;;  %v436_v53 = vld [vmem:[%s1497_s6 + $0xd8] sm:$0xff] }
  0x84   : > { %v997_v51 = vpack.c.bf16 %v434_v50, %v433_v49  ;;  %v1001_v54 = vpack.c.bf16 %v436_v53, %v435_v52  ;;  %v437_v55 = vld [vmem:[%s1497_s6 + $0xe0] sm:$0xff]  ;;  %v438_v56 = vld [vmem:[%s1497_s6 + $0xe8] sm:$0xff]  ;;  %v439_v0 = vld [vmem:[%s1497_s6 + $0xf0] sm:$0xff] }
  0x85   : > { %870 = vmatmul.mubr.msk.bf16.vlgmr.msra.gmra.mrb[0].mxu0 %vm362_vm2, %v1103_v21  ;;  %960 = vmatpush3.bf16.msra.mxu1 %v957_v20  ;;  %v1005_v57 = vpack.c.bf16 %v438_v56, %v437_v55  ;;  %v440_v1 = vld [vmem:[%s1497_s6 + $0xf8] sm:$0xff]  ;;  %v814_v4 = vld [vmem:[%s1512_s7] ss:$0 sm:$0xff]  ;;  %v815_v11 = vld [vmem:[%s1512_s7 + $0x1] ss:$0 sm:$0xff] }
  0x86   : > { %962 = vmatprep.subr.bf16.mxu1 %v961_v24  ;;  %984 = vmatpush3.bf16.msra.mxu0 %v981_v40  ;;  %v1009_v2 = vpack.c.bf16 %v440_v1, %v439_v0 }
  0x87   : > { %986 = vmatprep.subr.bf16.mxu0 %v985_v42 }
  0x89   : > { %964 = vmatpush3.bf16.msra.mxu1 %v961_v24 }
  0x8a   : > { %966 = vmatprep.subr.bf16.mxu1 %v965_v27  ;;  %988 = vmatpush3.bf16.msra.mxu0 %v985_v42 }
  0x8b   : > { %990 = vmatprep.subr.bf16.mxu0 %v989_v45 }
  0x8d   : > { %968 = vmatpush3.bf16.msra.mxu1 %v965_v27 }
  0x8e   : > { %970 = vmatprep.subr.bf16.mxu1 %v969_v30  ;;  %992 = vmatpush3.bf16.msra.mxu0 %v989_v45 }
  0x8f   : > { %994 = vmatprep.subr.bf16.mxu0 %v993_v48 }
  0x91   : > { %972 = vmatpush3.bf16.msra.mxu1 %v969_v30 }
  0x92   : > { %974 = vmatprep.subr.bf16.mxu1 %v973_v33  ;;  %996 = vmatpush3.bf16.msra.mxu0 %v993_v48 }
  0x93   : > { %998 = vmatprep.subr.bf16.mxu0 %v997_v51 }
  0x95   : > { %976 = vmatpush3.bf16.msra.mxu1 %v973_v33 }
  0x96   : > { %978 = vmatprep.subr.bf16.mxu1 %v977_v36  ;;  %1000 = vmatpush3.bf16.msra.mxu0 %v997_v51 }
  0x97   : > { %1002 = vmatprep.subr.bf16.mxu0 %v1001_v54 }
  0x99   : > { %980 = vmatpush3.bf16.msra.mxu1 %v977_v36 }
  0x9a   : > { %1004 = vmatpush3.bf16.msra.mxu0 %v1001_v54 }
  0x9b   : > { %1006 = vmatprep.subr.bf16.mxu0 %v1005_v57 }
  0x9e   : > { %1008 = vmatpush3.bf16.msra.mxu0 %v1005_v57 }
  0x9f   : > { %1010 = vmatprep.subr.bf16.mxu0 %v1009_v2 }
  0xa2   : > { %1012 = vmatpush3.bf16.msra.mxu0 %v1009_v2 }
 0x158   : > { %v400_v58 = vpop.f32.mrb[0].mxu0 }
 0x159   : > { %v871_v59 = vpop.f32.mrb[1].mxu0  ;;  %v407_v60 = vadd.f32 %v400_v58, %v1526_v17 }
 0x15a   : > { %v403_v61 = vpop.f32.mrb[2].mxu0 }
 0x15b   : > { %v408_v62 = vadd.f32 %v403_v61, %v1528_v18  ;;  %v872_v63 = vpop.f32.mrb[3].mxu0  ;;  %905 = vmatprep.mubr.f32.mxu1 %v407_v60 }
 0x15d   : > { %906 = vmatmul.mubr.f32.vlgmr.msra.gmra.mrb[0].mxu1 %v408_v62 }
 0x230   : > { %v907_v5 = vpop.f32.mrb[0].mxu1 }
 0x231   : > { %v521_v6 = vadd.f32 %v907_v5, %v814_v4  ;;  %v515_v7 = vpop.f32.mrb[1].mxu1 }
 0x232   : > { %v516_v8 = vadd.f32 %v814_v4, %v515_v7 }
 0x233   : > { %v525_v10 = vmax.f32 %v521_v6, 0.0 }
 0x234   : > { %v524_v9 = vmax.f32 %v516_v8, 0.0 }
 0x236   : > { %940 = vmatprep.mubr.f32.mxu0 %v524_v9 }
 0x237   : > { %941 = vmatmul.mubr.f32.vlgmr.msra.gmra.mrb[4].mxu0 %v525_v10 }
 0x308   : > { %611 = sbr.rel (%p816_p1) target bundleno = 785 (0x311), region = 60 }
 0x30a   : > { %v942_v12 = vpop.f32.mrb[4].mxu0 }
 0x30b   : > { %v604_v13 = vadd.f32 %v942_v12, %v815_v11  ;;  %v598_v14 = vpop.f32.mrb[5].mxu0 }
 0x30c   : > { %v599_v15 = vadd.f32 %v815_v11, %v598_v14 }
 0x30d   : > { %v608_v16 = vmax.f32 %v604_v13, 0.0 }
 0x30e   : > { %v607_v17 = vmax.f32 %v599_v15, 0.0 }
 0x30f   : > { %613 = vst [vmem:[#allocation3 + $0x8] sm:$0xff] %v608_v16 }
 0x310   : > { %612 = vst [vmem:[#allocation3] sm:$0xff] %v607_v17 }
 0x311 PF: > { %p817_p2 = scmp.ne.s32.totalorder %s1647_s13, 1 }
 0x312   : > { %618 = vst [vmem:[#allocation2] sm:$0xff] (!%p817_p2), %v607_v17  ;;  %619 = vst [vmem:[#allocation2 + $0x8] sm:$0xff] (!%p817_p2), %v608_v16 }
 0x313   : > { %617 = sbr.rel (%p817_p2) target bundleno = 794 (0x31a), region = 64 }
 0x31a PF: > { %943 = vmatprep.subr.bf16.mxu1 %v1288_v3  ;;  %v626_v18 = vpack.c.bf16 %v608_v16, %v607_v17  ;;  %945 = vmatprep.mubr.msk.bf16.mxu1 %vm1289_vm0, %v1288_v3  ;;  %623 = vst [vmem:[#allocation4] sm:$0x3] %v1288_v3  ;;  %v625_v19 = vld [vmem:[%s1617_s2] sm:$0x1]  ;;  %p672_p4 = scmp.eq.s32.totalorder %s1270_s21, 1 }
 0x31c   : > { %944 = vmatpush3.bf16.msra.mxu1 %v626_v18 }
 0x31f   : > { %946 = vmatmul.mubr.msk.bf16.vlgmr.msra.gmra.mrb[4].mxu1 %vm362_vm2, %v625_v19 }
 0x321   : > { %v624_v20 = vld [vmem:[#allocation4] sm:$0x3] }
 0x3ef   : > { %676 = sbr.rel (!%p672_p4) target bundleno = 1022 (0x3fe), region = 72 }
 0x3f2   : > { %v664_v21 = vpop.f32.mrb[4].mxu1 }
 0x3f3   : > { %v670_v22 = vadd.f32 %v664_v21, %v624_v20  ;;  %v947_v23 = vpop.f32.mrb[5].mxu1 }
 0x3f4   : > { %v667_v24 = vpop.f32.mrb[6].mxu1 }
 0x3f5   : > { %671 = vst [vmem:[#allocation4] sm:$0x3] %v670_v22  ;;  %v948_v25 = vpop.f32.mrb[7].mxu1 }
 0x3fc   : > { %v677_v26 = vld [vmem:[#allocation4] sm:$0x3] }
 0x3fd   : > { %678 = vst [vmem:[#allocation11] sm:$0x3] %v677_v26 }
 0x3fe PF: > { %p1043_p8 = scmp.eq.s32.totalorder %s1350_s24, 1  ;;  %s1290_s14 = smov [#allocation11]  }
 0x3ff   : > { %s686_s15 = sshll.u32 %s1290_s14, 4  ;;  %s687_s15 = int_to_ptr.vmem [resolvable:$true] %s686_s15 }
 0x400   : > { %s1190_s26 = scalar_lea.vmem %s687_s15, 32  ;;  %p1197_p9 = scmp.lt.s32.totalorder %s687_s15, %s687_s15 }
 0x401   : > { %p1191_p13 = scmp.ne.s32.totalorder %s687_s15, %s1190_s26  ;;  %p1198_p10 = scmp.lt.s32.totalorder %s1190_s26, %s1190_s26 }
 0x403   : > { %p1192_p5 = pnand %p1191_p13, %p1043_p8  ;;  %p1199_p7 = por %p1198_p10, %p1197_p9 }
 0x405   : > { %p1193_p6 = pneg %p1192_p5 }
 0x407   : > { %p1200_p11 = pnand %p1199_p7, %p1193_p6 }
 0x409   : > { %1203 = shalt.err (!%p1200_p11)
}
 0x40a   : > { %s1204_s29 = scalar_lea.hbm %s1620_s5, 32 }
 0x40b   : > { %p1205_p0 = scmp.ne.s32.totalorder %s1620_s5, %s1204_s29  ;;  %p1210_p1 = scmp.lt.u32.totalorder %s1204_s29, %s1620_s5 }
 0x40d   : > { %p1206_p3 = pnand %p1205_p0, %p1043_p8 }
 0x40f   : > { %p1207_p12 = pneg %p1206_p3 }
 0x411   : > { %p1212_p2 = pnand %p1210_p1, %p1207_p12 }
 0x413   : > { %1215 = shalt.err (!%p1212_p2)
}
 0x414   : > { %1024 = dma.vmem_to_hbm [thread:$0]  (%p1043_p8), %s687_s15, 32, %s1620_s5, [#allocation7]  }
 0x415   : > { %1253 = dma.done.wait (%p1043_p8), [#allocation7], 32  }
 0x416   : > { %1255 = vsyncadd (%p1043_p8), [#allocation7], 4294967264 }
 0x417 PF: > { %s18_s23 = sadd.s32 1, %s1278_s23   ;;  %s1637_s18 = smov %s1262_s19 }
 0x418   : > { %p15_p4 = scmp.ge.s32.totalorder %s18_s23, 4   ;;  %s1638_s19 = smov %s1266_s20 }
 0x419   : > { %s1639_s20 = smov %s1483_s9  ;;  %s1640_s21 = smov %s1274_s22 }
 0x41a   : > { %s1641_s22 = smov %s1643_s8  ;;  %17 = sbr.rel (!%p15_p4) target bundleno = 5 (0x5), region = 113 }
 0x421   :  { %699 = vsyncpa [#allocation6], 1 }
 0x422   :  { %701 = vsyncpa [#allocation6 + $0x1], 1 }
 0x423   :  { %702 = vsyncpa [#allocation9], 1 }
 0x424   :  { %703 = vsyncpa [#allocation7], 1 }
 0x425   :  { %705 = vsyncpa [#allocation7 + $0x1], 1 }

</bundles_post_ra>
